<compile_context>
chip_gen: v5e
topology: v5e:2x2
jax: 0.10.0
libtpu: 0.0.40
codegen_flags: <defaults>
</compile_context>

<pallas_src>
import jax
import jax.numpy as jnp
from jax.experimental import pallas as pl
from jax.experimental.pallas import tpu as pltpu


def conv1x1_kernel(x_ref, p_ref, o_ref):
    """1x1 conv as a VPU broadcast FMA (no MXU).

    x_ref: (Cin, TP)        input pixel slab, pixels on the lane axis
    p_ref: (Cout, Cin + 1)  fused [weight | bias] operand (resident)
    o_ref: (Cout, TP)       output slab, lane-dense
    """
    cin = x_ref.shape[0]
    x = x_ref[...].astype(jnp.float32)
    p = p_ref[...].astype(jnp.float32)

    # Outer product via broadcasting: (Cout, 1) * (1, TP) -> (Cout, TP).
    acc = p[:, 0:1] * x[0:1, :]
    for ci in range(1, cin):  # static, tiny Cin (== 1 for ToyModel)
        acc = acc + p[:, ci:ci + 1] * x[ci:ci + 1, :]

    # Bias column broadcast across lanes; cast only at the final store.
    o_ref[...] = (acc + p[:, cin:cin + 1]).astype(o_ref.dtype)


def _pick_hw_tile(hw, cin, cout, dtype_bytes=4, vmem_budget_bytes=8 << 20):
    """Largest pixel tile that keeps the double-buffered working set modest.

    At toy sizes this returns the full H*W (single tile per batch element),
    which also sidesteps the 128-divisibility constraint (full-extent block).
    """
    per_pixel = 2 * (cin + cout) * dtype_bytes  # x2 for double buffering
    if hw * per_pixel <= vmem_budget_bytes or hw % 128 != 0:
        return hw
    tile = max((vmem_budget_bytes // per_pixel) // 128 * 128, 128)
    tile = min(tile, hw)
    while hw % tile != 0:  # terminates at 128 since hw % 128 == 0 here
        tile -= 128
    return tile


def toy_model_forward(x, weight, bias):
    """Pallas implementation of ToyModel.forward (1x1 Conv2d).

    x:      (N, Cin, H, W)    float32, NCHW like PyTorch
    weight: (Cout, Cin, 1, 1) float32 (PyTorch Conv2d weight layout)
    bias:   (Cout,)           float32
    returns (N, Cout, H, W)   float32, NCHW
    """
    N, Cin, H, W = x.shape
    Cout = weight.shape[0]
    HW = H * W

    # NCHW -> (N, Cin, H*W): pure reshape (channels already precede spatial).
    x_slab = x.reshape(N, Cin, HW)

    # Fuse weight (Cout, Cin) and bias (Cout,) into one (Cout, Cin+1) operand.
    params = jnp.concatenate(
        [weight.reshape(Cout, Cin), bias.reshape(Cout, 1)], axis=1
    ).astype(x.dtype)

    hw_tile = _pick_hw_tile(HW, Cin, Cout, dtype_bytes=x.dtype.itemsize)
    hw_tiles = HW // hw_tile

    out_slab = pl.pallas_call(
        conv1x1_kernel,
        out_shape=jax.ShapeDtypeStruct((N, Cout, HW), x.dtype),
        grid_spec=pltpu.PrefetchScalarGridSpec(
            num_scalar_prefetch=0,
            grid=(N, hw_tiles),
            in_specs=[
                # Per-batch pixel slab; leading batch dim squeezed out.
                pl.BlockSpec((None, Cin, hw_tile), lambda n, p: (n, 0, p)),
                # Single fused, resident [W | b] operand.
                pl.BlockSpec((Cout, Cin + 1), lambda n, p: (0, 0)),
            ],
            out_specs=pl.BlockSpec((None, Cout, hw_tile), lambda n, p: (n, 0, p)),
        ),
        compiler_params=pltpu.CompilerParams(
            dimension_semantics=("parallel", "parallel"),
        ),
    )(x_slab, params)

    # (N, Cout, H*W) -> NCHW: free reshape, no transpose.
    return out_slab.reshape(N, Cout, H, W)


if __name__ == "__main__":
    # Shapes fixed by the module: in_channels=1, n_classes=4; batch=2, 16x16.
    n_classes = 4
    N, Cin, H, W = 2, 1, 16, 16

    key = jax.random.PRNGKey(0)
    k_x, k_w, k_b = jax.random.split(key, 3)

    x = jax.random.normal(k_x, (N, Cin, H, W), dtype=jnp.float32)
    weight = jax.random.normal(k_w, (n_classes, Cin, 1, 1), dtype=jnp.float32) * 0.1
    bias = jax.random.normal(k_b, (n_classes,), dtype=jnp.float32) * 0.1

    out = toy_model_forward(x, weight, bias)
    out = jax.block_until_ready(out)

    # Reference check in plain JAX (same math as the 1x1 conv).
    ref = (
        jnp.einsum("nchw,oc->nohw", x, weight.reshape(n_classes, Cin))
        + bias[None, :, None, None]
    )
    assert out.shape == (N, n_classes, H, W)
    assert jnp.allclose(out, ref, atol=1e-5, rtol=1e-5)

    print("KERNEL_OK")
</pallas_src>

<mosaic_0001>
module attributes {stable_mosaic.version = 11 : i64} {
  func.func @conv1x1_kernel(%arg0: i32, %arg1: i32, %arg2: memref<1x1x256xf32, #tpu.memory_space<vmem>>, %arg3: memref<4x2xf32, #tpu.memory_space<vmem>>, %arg4: memref<1x4x256xf32, #tpu.memory_space<vmem>>) attributes {dimension_semantics = [#tpu.dimension_semantics<parallel>, #tpu.dimension_semantics<parallel>], iteration_bounds = array<i64: 2, 1>, scalar_prefetch = 0 : i64, scratch_operands = 0 : i64, tpu.core_type = #tpu.core_type<tc>, window_params = [{transform_indices = @transform_0, window_bounds = array<i64: 1, 1, 256>}, {pipeline_mode = #tpu.pipeline_mode<synchronous>, transform_indices = @transform_1, window_bounds = array<i64: 4, 2>}, {transform_indices = @transform_2, window_bounds = array<i64: 1, 4, 256>}]} {
    %c0 = arith.constant 0 : index
    %c0_0 = arith.constant 0 : index
    %c0_1 = arith.constant 0 : index
    %0 = vector.load %arg2[%c0, %c0_0, %c0_1] : memref<1x1x256xf32, #tpu.memory_space<vmem>>, vector<1x1x256xf32>
    %1 = vector.shape_cast %0 : vector<1x1x256xf32> to vector<1x256xf32>
    %c0_2 = arith.constant 0 : index
    %c0_3 = arith.constant 0 : index
    %2 = vector.load %arg3[%c0_2, %c0_3] : memref<4x2xf32, #tpu.memory_space<vmem>>, vector<4x2xf32>
    %3 = vector.extract_strided_slice %2 {offsets = [0, 0], sizes = [4, 1], strides = [1, 1]} : vector<4x2xf32> to vector<4x1xf32>
    %4 = vector.broadcast %3 : vector<4x1xf32> to vector<4x256xf32>
    %5 = vector.broadcast %1 : vector<1x256xf32> to vector<4x256xf32>
    %6 = arith.mulf %4, %5 : vector<4x256xf32>
    %7 = vector.extract_strided_slice %2 {offsets = [0, 1], sizes = [4, 1], strides = [1, 1]} : vector<4x2xf32> to vector<4x1xf32>
    %8 = vector.broadcast %7 : vector<4x1xf32> to vector<4x256xf32>
    %9 = arith.addf %6, %8 : vector<4x256xf32>
    %c0_4 = arith.constant 0 : index
    %c0_5 = arith.constant 0 : index
    %c0_6 = arith.constant 0 : index
    %10 = vector.load %arg4[%c0_4, %c0_5, %c0_6] : memref<1x4x256xf32, #tpu.memory_space<vmem>>, vector<1x4x256xf32>
    %11 = vector.shape_cast %10 : vector<1x4x256xf32> to vector<4x256xf32>
    %12 = vector.shape_cast %9 : vector<4x256xf32> to vector<1x4x256xf32>
    tpu.vector_store %arg4[%c0_4, %c0_5, %c0_6], %12 {strides = array<i32>} : memref<1x4x256xf32, #tpu.memory_space<vmem>>, vector<1x4x256xf32>,
    return
  }
  func.func @transform_0(%arg0: i32, %arg1: i32) -> (i32, i32, i32) {
    %c0_i32 = arith.constant 0 : i32
    %c0_i32_0 = arith.constant 0 : i32
    return %arg0, %c0_i32, %arg1 : i32, i32, i32
  }
  func.func @transform_1(%arg0: i32, %arg1: i32) -> (i32, i32) {
    %c0_i32 = arith.constant 0 : i32
    %c0_i32_0 = arith.constant 0 : i32
    %c0_i32_1 = arith.constant 0 : i32
    return %c0_i32, %c0_i32_0 : i32, i32
  }
  func.func @transform_2(%arg0: i32, %arg1: i32) -> (i32, i32, i32) {
    %c0_i32 = arith.constant 0 : i32
    %c0_i32_0 = arith.constant 0 : i32
    return %arg0, %c0_i32, %arg1 : i32, i32, i32
  }
}

</mosaic_0001>

<bundles_post_ra>
// kernel: tpu_custom_call.1
= control target key start
LH: loop header
LB: loop body
LE: loop exit
PB: predicated region body
PF: predicated region fallthrough
CT: control target
= control target key end

     0   :  { %7 = vsyncpa [#allocation3], 0  ;;  %s558_s0 = inlined_call_operand.vmem [shape: f32[2,1,256], index: 0, kind: input, shape index: {}]   ;;  %s559_s1 = inlined_call_operand.vmem [shape: f32[4,2], index: 1, kind: input, shape index: {}]   ;;  %s560_s2 = inlined_call_operand.hbm [shape: f32[2,4,256], index: 2, kind: output, shape index: {}]  }
   0x1   :  { %9 = vsyncpa [#allocation3 + $0x1], 0  ;;  %s458_s9 = smov 0   ;;  %s460_s10 = smov 0  }
   0x2   :  { %s462_s11 = smov 0   ;;  %s464_s12 = smov 0  }
   0x3   :  { %s466_s13 = smov 0   ;;  %s468_s14 = smov 0  }
   0x4 LB: > { %s289_s15 = sadd.s32 4294967295, %s439_s14   ;;  %s290_s16 = sadd.s32 4294967294, %s439_s14   ;;  %s439_s14 = sphi %s468_s14, %s15_s14   ;;  %s435_s13 = sphi %s466_s13, %s567_s13   ;;  %s431_s12 = sphi %s464_s12, %s566_s12   ;;  %s427_s11 = sphi %s462_s11, %s565_s11   ;;  %s423_s10 = sphi %s460_s10, %s564_s10   ;;  %s419_s9 = sphi %s458_s9, %s563_s9  }
   0x5   : > { %s27_s17 = sadd.s32 1, %s435_s13  ;;  %s85_s18 = sadd.s32 1, %s427_s11 }
   0x6   : > { %p29_p0 = scmp.ge.s32.totalorder %s27_s17, 2  ;;  %p95_p1 = scmp.ne.s32.totalorder %s427_s11, %s423_s10 }
   0x7   : > { %p96_p2 = scmp.eq.s32.totalorder %s289_s15, 1  ;;  %p101_p3 = scmp.ne.s32.totalorder %s423_s10, %s419_s9 }
   0x8   : > { %s569_s17 = smov (%p29_p0, %s27_s17), 0  ;;  %p102_p5 = scmp.eq.s32.totalorder %s290_s16, 1 }
   0x9   : > { %p498_p4 = por %p96_p2, %p95_p1  ;;  %s80_s20 = ssub.s32 %s435_s13, %s569_s17 }
   0xa   : > { %p293_p6 = scmp.ge.s32.totalorder %s439_s14, 1  ;;  %p83_p7 = scmp.eq.s32.totalorder %s80_s20, 0 }
   0xb   : > { %p505_p8 = por %p102_p5, %p101_p3  ;;  %p135_p9 = scmp.lt.s32.totalorder %s439_s14, 3 }
   0xc   : > { %s511_s22 = scalar_select %p83_p7, %s427_s11, %s85_s18  }
   0xd   : > { %p136_p10 = pnand %p293_p6, %p135_p9 }
   0xe   : > { %p161_p11 = scmp.lt.s32.totalorder (!%p136_p10), %s431_s12, 1  ;;  %s157_s30 = sand.u32 (!%p136_p10), 1, %s423_s10  }
   0xf   : > { %139 = sbr.rel (%p136_p10) target bundleno = 154 (0x9a), region = 28  ;;  %s294_s3 = sshll.u32 (!%p136_p10), %s157_s30, 3 }
  0x10   : > { %s301_s4 = sshll.u32 (!%p136_p10), %s431_s12, 3  ;;  %s159_s8 = scalar_lea.vmem (!%p136_p10), [#allocation2], %s294_s3 }
  0x11   : > { %s211_s7 = scalar_lea.hbm (!%p136_p10), %s560_s2, %s301_s4  ;;  %s213_s15 = sshll.u32 (!%p136_p10), %s159_s8, 4  ;;  %s214_s15 = int_to_ptr.vmem [resolvable:$true] %s213_s15 }
  0x12   : > { %s215_s16 = sshll.u32 (!%p136_p10), %s211_s7, 4  ;;  %s216_s16 = int_to_ptr.hbm [resolvable:$true] %s215_s16 }
  0x13   : > { %s375_s18 = sshra.s32 (!%p136_p10), %s216_s16, 4  ;;  %s376_s18 = int_to_ptr.hbm [resolvable:$true] %s375_s18 }
  0x14   : > { %v171_v0 = vld [vmem:[%s559_s1] sm:$0xf]  ;;  %v441_v1 = vmov 0   ;;  %v442_v2 = vmov 1   ;;  %s162_s25 = scalar_select %p161_p11, %s431_s12, 1  ;;  %vm193_vm0 = vcmask 1043456  }
  0x15   : > { %359 = vset.pattern.permute.xlu0 %v441_v1  ;;  %s198_s12 = scalar_lea.sflag [#allocation3], %s157_s30  ;;  %s377_s20 = scalar_lea.hbm %s376_s18, 8 }
  0x16   : > { %174 = vperm.xlu0 %359, %v171_v0   ;;  %s295_s26 = sshll.u32 %s162_s25, 1  ;;  %p378_p12 = scmp.ne.s32.totalorder %s376_s18, %s377_s20 }
  0x17   : > { %s167_s29 = scalar_lea.vmem %s558_s0, %s295_s26  ;;  %s381_s25 = scalar_lea.hbm %s560_s2, 16 }
  0x18   : > { %v170_v4 = vld [vmem:[%s167_s29] sm:$0x3]  ;;  %p379_p13 = pnand %p378_p12, %p498_p4  ;;  %p382_p1 = scmp.lt.s32.totalorder %s376_s18, %s560_s2 }
  0x19   : > { %v179_v5 = vperm.slane %v170_v4, 1  ;;  %v178_v6 = vperm.slane %v170_v4, 0  ;;  %p383_p2 = scmp.lt.s32.totalorder %s381_s25, %s377_s20 }
  0x1a   : > { %p380_p0 = pneg %p379_p13 }
  0x1b   : > { %p384_p3 = por %p383_p2, %p382_p1 }
  0x1d   : > { %p385_p5 = pnand %p384_p3, %p380_p0 }
  0x1e   : > { %360 = vset.pattern.permute.xlu0 %v442_v2 }
  0x1f   : > { %185 = vperm.xlu0 %360, %v171_v0  }
  0x88   : > { %v175_v3 = vpop.permute.xlu0 %174 }
  0x89   : > { %v183_v7 = vmul.f32 %v179_v5, %v175_v3  ;;  %v182_v9 = vmul.f32 %v178_v6, %v175_v3 }
  0x91   : > { %v186_v8 = vpop.permute.xlu0 %185 }
  0x92   : > { %v189_v10 = vadd.f32 %v186_v8, %v183_v7  ;;  %v188_v11 = vadd.f32 %v186_v8, %v182_v9 }
  0x94   : > { %v192_v12 = vrot.slane %v189_v10, 4 }
  0x96   : > { %v194_v13 = vsel %vm193_vm0, %v188_v11, %v192_v12 }
  0x97   : > { %196 = vst [vmem:[%s159_s8] sm:$0xff] %v194_v13 }
  0x98   : > { %388 = shalt.err (!%p385_p5)
}
  0x99   : > { %302 = dma.vmem_to_hbm [thread:$0]  (%p498_p4), %s214_s15, 128, %s216_s16, %s198_s12  }
  0x9a PF: > { %p308_p6 = scmp.ge.s32.totalorder %s439_s14, 2  ;;  %s227_s28 = sand.u32 1, %s419_s9  }
  0x9b   : > { %s228_s29 = scalar_lea.sflag [#allocation3], %s227_s28 }
  0x9c   : > { %p305_p7 = pnand %p308_p6, %p505_p8 }
  0x9e   : > { %p306_p9 = pneg %p305_p7 }
  0xa0   : > { %414 = dma.done.wait (%p306_p9), %s228_s29, 128  }
  0xa1   : > { %416 = vsyncadd (%p306_p9), %s228_s29, 4294967168  ;;  %s15_s14 = sadd.s32 1, %s439_s14   ;;  %s563_s9 = smov %s423_s10 }
  0xa2   : > { %p12_p10 = scmp.ge.s32.totalorder %s15_s14, 4   ;;  %s564_s10 = smov %s427_s11 }
  0xa3   : > { %s565_s11 = smov %s511_s22  ;;  %s566_s12 = smov %s435_s13 }
  0xa4   : > { %s567_s13 = smov %s569_s17  ;;  %14 = sbr.rel (!%p12_p10) target bundleno = 4 (0x4), region = 63 }
  0xa9   :  { %234 = vsyncpa [#allocation3], 1 }
  0xaa   :  { %236 = vsyncpa [#allocation3 + $0x1], 1 }

</bundles_post_ra>
